<compile_context>
chip_gen: v6e
topology: v6e:2x2x1
jax: 0.10.0
libtpu: 0.0.40
codegen_flags: <defaults>
</compile_context>

<pallas_src>
import numpy as np
import jax
import jax.numpy as jnp
from jax.experimental import pallas as pl
from jax.experimental.pallas import tpu as pltpu


def _cdiv(a: int, b: int) -> int:
    return (a + b - 1) // b


_VMEM_BUDGET = 28 * 1024 * 1024   # conservative tile budget (fits v5e/v6e/v7x)
_VMEM_LIMIT = 48 * 1024 * 1024    # raised scoped-VMEM limit (< 64 MiB v7x physical)


def _select_tiles(B: int, L: int, D: int, itemsize: int):
    """Pick (tm, tk, ragged_k) under a VMEM budget.

    tm: batch tile   (second-to-last block dim: multiple of 8, or == B).
    tk: feature tile (last block dim: multiple of 128, or == L); exact divisors
        of L are preferred so no in-kernel ragged masking of x is needed.
    """
    if B >= 1024:
        tm = 512                       # >= 2 parallel M blocks for v7x megacore
    elif B >= 16:
        tm = max(8, (B // 2) // 8 * 8)  # keep >= 2 M blocks
    else:
        tm = B                         # full batch dim (valid block size)

    def vmem_estimate(tm_, tk_, ragged_):
        x_bytes = 2 * tm_ * tk_ * itemsize                 # double-buffered x tile
        out_bytes = 2 * tm_ * D * itemsize + tm_ * D * 4   # out blocks + f32 acc
        mask_bytes = tk_ * D * (8 + itemsize)               # iota/compare/P temporaries
        ragged_bytes = tm_ * tk_ * 8 if ragged_ else 0      # column-iota/select temps
        return x_bytes + out_bytes + mask_bytes + ragged_bytes + 8 * D * 4

    lane_tiles = (2048, 1792, 1536, 1280, 1024, 896, 768, 640, 512, 384, 256, 128)

    def pick_tk(max_tk):
        for cand in lane_tiles:          # exact divisor -> no ragged K tile
            if cand <= max_tk and L % cand == 0:
                return cand, False
        if L <= max_tk:
            return L, False              # whole feature dim as one block
        return max_tk, True              # ragged last K tile (masked in-kernel)

    tk, ragged = pick_tk(2048)
    for max_tk in (2048, 1024, 512, 256, 128):
        tk, ragged = pick_tk(max_tk)
        if vmem_estimate(tm, tk, ragged) <= _VMEM_BUDGET:
            break
    while vmem_estimate(tm, tk, ragged) > _VMEM_BUDGET and tm > 8:
        tm = max(8, (tm // 2) // 8 * 8)
    return tm, tk, ragged


def mean_mapper(features: jax.Array, preprocessing_dim: int) -> jax.Array:
    """Pallas TPU implementation of MeanMapper.forward.

    features: any shape with leading batch dim B (e.g. NCHW); flattened to
    (B, L) row-major, exactly like torch .reshape(len(features), 1, -1).
    Returns (B, preprocessing_dim) in the input dtype.
    """
    B = features.shape[0]
    x = features.reshape(B, -1)
    if not jnp.issubdtype(x.dtype, jnp.floating):
        x = x.astype(jnp.float32)       # adaptive_avg_pool1d is float-only
    L = x.shape[1]
    D = int(preprocessing_dim)
    in_dtype = x.dtype
    itemsize = jnp.dtype(in_dtype).itemsize

    # Exact adaptive_avg_pool1d window boundaries, computed host-side in int64
    # (avoids int32 overflow of (i+1)*L for very large L*D).
    idx = np.arange(D, dtype=np.int64)
    starts64 = (idx * L) // D
    ends64 = ((idx + 1) * L + D - 1) // D
    counts = (ends64 - starts64).astype(np.float64)
    starts = jnp.asarray(starts64.reshape(1, D), dtype=jnp.int32)
    ends = jnp.asarray(ends64.reshape(1, D), dtype=jnp.int32)
    inv_counts = jnp.asarray((1.0 / counts).reshape(1, D), dtype=jnp.float32)

    tm, tk, ragged = _select_tiles(B, L, D, itemsize)
    num_m = _cdiv(B, tm)
    num_k = _cdiv(L, tk)

    def kernel(x_ref, starts_ref, ends_ref, invc_ref, o_ref, acc_ref):
        # Grid: (m, k).  k (axis 1) is the reduction over flattened features;
        # acc_ref is a per-core f32 VMEM scratch resident across it.
        k = pl.program_id(1)

        @pl.when(k == 0)
        def _():
            acc_ref[...] = jnp.zeros_like(acc_ref)

        x = x_ref[...]
        if ragged:  # static: only emitted when L % tk != 0
            # The last K block reads past L; that data is undefined, and
            # NaN/Inf there would survive multiplication by the zero mask,
            # so zero those columns of x explicitly.
            col = jax.lax.broadcasted_iota(jnp.int32, x.shape, 1)
            x = jnp.where(col < (L - k * tk), x, 0)

        # On-the-fly (tk, D) tile of the pooling matrix:
        #   P[j, i] = 1  iff  starts[i] <= j + k*tk < ends[i]
        # Thresholds are shifted by -k*tk ((1, D) int ops) and compared against
        # a k-independent base iota (one fewer full-(tk,D) VPU pass per step).
        base = jax.lax.broadcasted_iota(jnp.int32, (tk, D), 0)
        s = starts_ref[...] - k * tk
        e = ends_ref[...] - k * tk
        p_tile = ((base >= s) & (base < e)).astype(x.dtype)  # 0/1 exact in bf16/f32

        acc_ref[...] += jnp.dot(x, p_tile, preferred_element_type=jnp.float32)

        # Final K step: per-column 1/window_count scaling and cast back to the
        # input dtype directly into the output block (no external f32 pass).
        @pl.when(k == pl.num_programs(1) - 1)
        def _():
            o_ref[...] = (acc_ref[...] * invc_ref[...]).astype(o_ref.dtype)

    cost = pl.CostEstimate(
        flops=2 * (num_m * tm) * (num_k * tk) * D,
        transcendentals=0,
        bytes_accessed=B * L * itemsize + B * D * itemsize + 3 * D * 4,
    )

    out = pl.pallas_call(
        kernel,
        out_shape=jax.ShapeDtypeStruct((B, D), in_dtype),
        grid_spec=pltpu.PrefetchScalarGridSpec(
            num_scalar_prefetch=0,
            grid=(num_m, num_k),
            in_specs=[
                pl.BlockSpec((tm, tk), lambda m, k: (m, k)),   # x tile
                pl.BlockSpec((1, D), lambda m, k: (0, 0)),     # window starts
                pl.BlockSpec((1, D), lambda m, k: (0, 0)),     # window ends
                pl.BlockSpec((1, D), lambda m, k: (0, 0)),     # 1 / counts
            ],
            out_specs=pl.BlockSpec((tm, D), lambda m, k: (m, 0)),
            scratch_shapes=[pltpu.VMEM((tm, D), jnp.float32)],  # f32 accumulator
        ),
        compiler_params=pltpu.CompilerParams(
            dimension_semantics=("parallel", "arbitrary"),
            vmem_limit_bytes=_VMEM_LIMIT,
        ),
        cost_estimate=cost,
    )(x, starts, ends, inv_counts)

    # TODO(synk): a banded-D grid (PrefetchScalarGridSpec with a per-D-tile
    # K-offset table so each column band only loops over the K blocks it
    # covers) would cut MXU flops ~(D/td)x for large D with f32 inputs, but at
    # PatchCore's small L/D (~4.5-9) it re-reads x ~2x and hurts the common
    # HBM-bound bf16 case, so it is intentionally not enabled here.
    return out.astype(features.dtype) if out.dtype != features.dtype else out


def _reference_mean_mapper(features: jax.Array, preprocessing_dim: int) -> jax.Array:
    """Pure-JAX reference of F.adaptive_avg_pool1d for correctness checking."""
    B = features.shape[0]
    x = features.reshape(B, -1).astype(jnp.float32)
    L = x.shape[1]
    D = preprocessing_dim
    cols = []
    for i in range(D):
        s = (i * L) // D
        e = ((i + 1) * L + D - 1) // D
        cols.append(jnp.mean(x[:, s:e], axis=1))
    return jnp.stack(cols, axis=1).astype(features.dtype)


if __name__ == "__main__":
    key = jax.random.PRNGKey(0)
    key0, key1 = jax.random.split(key)

    # Small NCHW-like input consistent with PatchCore feature maps.
    B, C, H, W = 2, 4, 16, 16          # L = C*H*W = 1024
    preprocessing_dim = 128
    features = jax.random.normal(key0, (B, C, H, W), dtype=jnp.float32)

    out = mean_mapper(features, preprocessing_dim)
    out = jax.block_until_ready(out)

    ref = _reference_mean_mapper(features, preprocessing_dim)
    assert out.shape == (B, preprocessing_dim), out.shape
    assert out.dtype == features.dtype, out.dtype
    assert jnp.allclose(out, ref, atol=1e-5, rtol=1e-5), "mismatch vs reference"

    # Second tiny check: exercises the ragged last-K-tile path (L = 2500 is not
    # divisible by any lane tile) and a non-multiple-of-128 output dim.
    feats2 = jax.random.normal(key1, (4, 4, 25, 25), dtype=jnp.float32)
    out2 = jax.block_until_ready(mean_mapper(feats2, 200))
    ref2 = _reference_mean_mapper(feats2, 200)
    assert out2.shape == (4, 200), out2.shape
    assert jnp.allclose(out2, ref2, atol=1e-5, rtol=1e-5), "mismatch vs reference (ragged)"

    print("KERNEL_OK")
</pallas_src>

<mosaic_0001>
module attributes {stable_mosaic.version = 11 : i64} {
  func.func @kernel(%arg0: i32, %arg1: i32, %arg2: memref<2x1024xf32, #tpu.memory_space<vmem>>, %arg3: memref<1x128xi32, #tpu.memory_space<vmem>>, %arg4: memref<1x128xi32, #tpu.memory_space<vmem>>, %arg5: memref<1x128xf32, #tpu.memory_space<vmem>>, %arg6: memref<2x128xf32, #tpu.memory_space<vmem>>, %arg7: memref<2x128xf32, #tpu.memory_space<vmem>>) attributes {dimension_semantics = [#tpu.dimension_semantics<parallel>, #tpu.dimension_semantics<arbitrary>], iteration_bounds = array<i64: 1, 1>, scalar_prefetch = 0 : i64, scratch_operands = 1 : i64, tpu.core_type = #tpu.core_type<tc>, window_params = [{transform_indices = @transform_0, window_bounds = array<i64: 2, 1024>}, {pipeline_mode = #tpu.pipeline_mode<synchronous>, transform_indices = @transform_1, window_bounds = array<i64: 1, 128>}, {pipeline_mode = #tpu.pipeline_mode<synchronous>, transform_indices = @transform_2, window_bounds = array<i64: 1, 128>}, {pipeline_mode = #tpu.pipeline_mode<synchronous>, transform_indices = @transform_3, window_bounds = array<i64: 1, 128>}, {transform_indices = @transform_4, window_bounds = array<i64: 2, 128>}]} {
    %c0_i32 = arith.constant 0 : i32
    %0 = arith.cmpi eq, %arg1, %c0_i32 : i32
    %1 = arith.extui %0 : i1 to i32
    %c0_i32_0 = arith.constant 0 : i32
    %2 = arith.cmpi ne, %1, %c0_i32_0 : i32
    scf.if %2 {
      %cst_13 = arith.constant 0.000000e+00 : f32
      %27 = vector.broadcast %cst_13 : f32 to vector<2x128xf32>
      %c0_14 = arith.constant 0 : index
      %c0_15 = arith.constant 0 : index
      %28 = vector.load %arg7[%c0_14, %c0_15] : memref<2x128xf32, #tpu.memory_space<vmem>>, vector<2x128xf32>
      tpu.vector_store %arg7[%c0_14, %c0_15], %27 {strides = array<i32>} : memref<2x128xf32, #tpu.memory_space<vmem>>, vector<2x128xf32>,
    } else {
    }
    %c0 = arith.constant 0 : index
    %c0_1 = arith.constant 0 : index
    %3 = vector.load %arg2[%c0, %c0_1] : memref<2x1024xf32, #tpu.memory_space<vmem>>, vector<2x1024xf32>
    %4 = tpu.iota {dimensions = array<i32: 0>} : vector<1024x128xi32>
    %c0_2 = arith.constant 0 : index
    %c0_3 = arith.constant 0 : index
    %5 = vector.load %arg3[%c0_2, %c0_3] : memref<1x128xi32, #tpu.memory_space<vmem>>, vector<1x128xi32>
    %c1024_i32 = arith.constant 1024 : i32
    %6 = arith.muli %arg1, %c1024_i32 : i32
    %7 = vector.broadcast %6 : i32 to vector<1x128xi32>
    %8 = arith.subi %5, %7 : vector<1x128xi32>
    %c0_4 = arith.constant 0 : index
    %c0_5 = arith.constant 0 : index
    %9 = vector.load %arg4[%c0_4, %c0_5] : memref<1x128xi32, #tpu.memory_space<vmem>>, vector<1x128xi32>
    %c1024_i32_6 = arith.constant 1024 : i32
    %10 = arith.muli %arg1, %c1024_i32_6 : i32
    %11 = vector.broadcast %10 : i32 to vector<1x128xi32>
    %12 = arith.subi %9, %11 : vector<1x128xi32>
    %13 = vector.broadcast %8 : vector<1x128xi32> to vector<1024x128xi32>
    %14 = arith.cmpi sge, %4, %13 : vector<1024x128xi32>
    %15 = vector.broadcast %12 : vector<1x128xi32> to vector<1024x128xi32>
    %16 = arith.cmpi slt, %4, %15 : vector<1024x128xi32>
    %17 = arith.andi %14, %16 : vector<1024x128xi1>
    %18 = arith.extui %17 : vector<1024x128xi1> to vector<1024x128xi32>
    %19 = arith.sitofp %18 : vector<1024x128xi32> to vector<1024x128xf32>
    %c0_7 = arith.constant 0 : index
    %c0_8 = arith.constant 0 : index
    %20 = vector.load %arg7[%c0_7, %c0_8] : memref<2x128xf32, #tpu.memory_space<vmem>>, vector<2x128xf32>
    %cst = arith.constant dense<0.000000e+00> : vector<2x128xf32>
    %21 = tpu.matmul %3, %19, %cst {dimension_numbers = #tpu.dot_dimension_numbers<[1], [0], [0], [1], [0, 0, 1, 1], [], []>} : vector<2x1024xf32>, vector<1024x128xf32>, vector<2x128xf32> -> vector<2x128xf32>
    %22 = arith.addf %20, %21 : vector<2x128xf32>
    %c0_9 = arith.constant 0 : index
    %c0_10 = arith.constant 0 : index
    %23 = vector.load %arg7[%c0_9, %c0_10] : memref<2x128xf32, #tpu.memory_space<vmem>>, vector<2x128xf32>
    tpu.vector_store %arg7[%c0_9, %c0_10], %22 {strides = array<i32>} : memref<2x128xf32, #tpu.memory_space<vmem>>, vector<2x128xf32>,
    %c0_i32_11 = arith.constant 0 : i32
    %24 = arith.cmpi eq, %arg1, %c0_i32_11 : i32
    %25 = arith.extui %24 : i1 to i32
    %c0_i32_12 = arith.constant 0 : i32
    %26 = arith.cmpi ne, %25, %c0_i32_12 : i32
    scf.if %26 {
      %c0_13 = arith.constant 0 : index
      %c0_14 = arith.constant 0 : index
      %27 = vector.load %arg7[%c0_13, %c0_14] : memref<2x128xf32, #tpu.memory_space<vmem>>, vector<2x128xf32>
      %c0_15 = arith.constant 0 : index
      %c0_16 = arith.constant 0 : index
      %28 = vector.load %arg5[%c0_15, %c0_16] : memref<1x128xf32, #tpu.memory_space<vmem>>, vector<1x128xf32>
      %29 = vector.broadcast %28 : vector<1x128xf32> to vector<2x128xf32>
      %30 = arith.mulf %27, %29 : vector<2x128xf32>
      %c0_17 = arith.constant 0 : index
      %c0_18 = arith.constant 0 : index
      %31 = vector.load %arg6[%c0_17, %c0_18] : memref<2x128xf32, #tpu.memory_space<vmem>>, vector<2x128xf32>
      tpu.vector_store %arg6[%c0_17, %c0_18], %30 {strides = array<i32>} : memref<2x128xf32, #tpu.memory_space<vmem>>, vector<2x128xf32>,
    } else {
    }
    return
  }
  func.func @transform_0(%arg0: i32, %arg1: i32) -> (i32, i32) {
    %c0_i32 = arith.constant 0 : i32
    return %arg0, %arg1 : i32, i32
  }
  func.func @transform_1(%arg0: i32, %arg1: i32) -> (i32, i32) {
    %c0_i32 = arith.constant 0 : i32
    %c0_i32_0 = arith.constant 0 : i32
    %c0_i32_1 = arith.constant 0 : i32
    return %c0_i32, %c0_i32_0 : i32, i32
  }
  func.func @transform_2(%arg0: i32, %arg1: i32) -> (i32, i32) {
    %c0_i32 = arith.constant 0 : i32
    %c0_i32_0 = arith.constant 0 : i32
    %c0_i32_1 = arith.constant 0 : i32
    return %c0_i32, %c0_i32_0 : i32, i32
  }
  func.func @transform_3(%arg0: i32, %arg1: i32) -> (i32, i32) {
    %c0_i32 = arith.constant 0 : i32
    %c0_i32_0 = arith.constant 0 : i32
    %c0_i32_1 = arith.constant 0 : i32
    return %c0_i32, %c0_i32_0 : i32, i32
  }
  func.func @transform_4(%arg0: i32, %arg1: i32) -> (i32, i32) {
    %c0_i32 = arith.constant 0 : i32
    %c0_i32_0 = arith.constant 0 : i32
    return %arg0, %c0_i32 : i32, i32
  }
}

</mosaic_0001>

<bundles_post_ra>
// kernel: tpu_custom_call.1
= control target key start
LH: loop header
LB: loop body
LE: loop exit
PB: predicated region body
PF: predicated region fallthrough
CT: control target
= control target key end

     0   :  { %9 = vsyncpa [#allocation4], 0  ;;  %s2350_s0 = inlined_call_operand.hbm [shape: f32[2,1024], index: 0, kind: input, shape index: {}]   ;;  %s2351_s1 = inlined_call_operand.vmem [shape: s32[1,128], index: 1, kind: input, shape index: {}]   ;;  %s2352_s2 = inlined_call_operand.vmem [shape: s32[1,128], index: 2, kind: input, shape index: {}]   ;;  %s2353_s3 = inlined_call_operand.vmem [shape: f32[1,128], index: 3, kind: input, shape index: {}]   ;;  %s2354_s4 = inlined_call_operand.hbm [shape: f32[2,128], index: 4, kind: output, shape index: {}]  }
   0x1   :  { %10 = vsyncpa [#allocation5], 0  ;;  %s1627_s15 = smov [#allocation3]  }
   0x2   :  { %s17_s16 = sshll.u32 %s1627_s15, 4  ;;  %s18_s16 = int_to_ptr.vmem [resolvable:$true] %s17_s16 }
   0x3   :  { %s1591_s17 = scalar_lea.vmem %s18_s16, 256  ;;  %p1596_p1 = scmp.lt.s32.totalorder %s18_s16, %s18_s16 }
   0x4   :  { %p1592_p0 = scmp.ne.s32.totalorder %s18_s16, %s1591_s17  ;;  %p1597_p2 = scmp.lt.s32.totalorder %s1591_s17, %s1591_s17 }
   0x6   :  { %p1598_p3 = por %p1597_p2, %p1596_p1 }
   0x8   :  { %p1599_p4 = pnand %p1598_p3, %p1592_p0 }
   0xa   :  { %1602 = shalt.err (!%p1599_p4)
}
   0xb   :  { %20 = dma.hbm_to_vmem [thread:$0]  %s2350_s0, 256, %s18_s16, [#allocation4]  }
   0xc   :  { %1623 = dma.done.wait [#allocation4], 256  }
   0xd   :  { %1624 = vsyncadd [#allocation4], 4294967040  ;;  %v37_v0 = vlaneseq  ;;  %v1671_v8 = vld [vmem:[%s2351_s1] ss:$0 sm:$0xff]  ;;  %v1628_v12 = vmov 1.0   ;;  %v35_v57 = vld [vmem:[#allocation3] sm:$0xff] }
   0xe   :  { %v1676_v9 = vld [vmem:[%s2352_s2] ss:$0 sm:$0xff]  ;;  %v1629_v43 = vmov 1983009808   ;;  %v823_v62 = vcombine.high %v35_v57, %v35_v57  ;;  %s1631_s27 = smov [#allocation6]  }
   0xf   :  { %v1660_v1 = vshrl.u32 %v37_v0, 7  ;;  %v825_v44 = vunpack.c.l.s4 %v1629_v43  ;;  %s1166_s28 = sshll.u32 %s1631_s27, 4  ;;  %s1167_s28 = int_to_ptr.vmem [resolvable:$true] %s1166_s28 }
  0x10   :  { %s1603_s29 = scalar_lea.vmem %s1167_s28, 32  ;;  %p1608_p6 = scmp.lt.s32.totalorder %s1167_s28, %s1167_s28 }
  0x11   :  { %v69_v2 = vadd.s32 248, %v1660_v1  ;;  %v101_v3 = vadd.s32 504, %v1660_v1  ;;  %v53_v4 = vadd.s32 120, %v1660_v1  ;;  %v85_v5 = vadd.s32 376, %v1660_v1  ;;  %p1604_p5 = scmp.ne.s32.totalorder %s1167_s28, %s1603_s29  ;;  %p1609_p7 = scmp.lt.s32.totalorder %s1603_s29, %s1603_s29 }
  0x12   :  { %v68_v6 = vadd.s32 240, %v1660_v1  ;;  %v100_v7 = vadd.s32 496, %v1660_v1  ;;  %v52_v10 = vadd.s32 112, %v1660_v1  ;;  %v84_v11 = vadd.s32 368, %v1660_v1 }
  0x13   :  { %vm207_vm0 = vcmp.ge.s32.totalorder %v69_v2, %v1671_v8  ;;  %vm339_vm1 = vcmp.lt.s32.totalorder %v69_v2, %v1676_v9  ;;  %vm239_vm2 = vcmp.ge.s32.totalorder %v101_v3, %v1671_v8  ;;  %vm371_vm3 = vcmp.lt.s32.totalorder %v101_v3, %v1676_v9  ;;  %p1610_p8 = por %p1609_p7, %p1608_p6 }
  0x14   :  { %vm467_vm4 = vmand %vm207_vm0, %vm339_vm1  ;;  %vm191_vm5 = vcmp.ge.s32.totalorder %v53_v4, %v1671_v8  ;;  %vm323_vm6 = vcmp.lt.s32.totalorder %v53_v4, %v1676_v9  ;;  %vm223_vm7 = vcmp.ge.s32.totalorder %v85_v5, %v1671_v8  ;;  %vm355_vm8 = vcmp.lt.s32.totalorder %v85_v5, %v1676_v9 }
  0x15   :  { %1434 = vmatprep.subr.msk.mxu0 %vm467_vm4, %v1628_v12  ;;  %vm499_vm9 = vmand %vm239_vm2, %vm371_vm3  ;;  %vm206_vm10 = vcmp.ge.s32.totalorder %v68_v6, %v1671_v8  ;;  %vm338_vm11 = vcmp.lt.s32.totalorder %v68_v6, %v1676_v9  ;;  %v67_v13 = vadd.s32 232, %v1660_v1  ;;  %vm238_vm13 = vcmp.ge.s32.totalorder %v100_v7, %v1671_v8  ;;  %p1611_p9 = pnand %p1610_p8, %p1604_p5 }
  0x16   :  { %1469 = vmatprep.subr.msk.mxu1 %vm499_vm9, %v1628_v12  ;;  %vm451_vm12 = vmand %vm191_vm5, %vm323_vm6  ;;  %vm370_vm14 = vcmp.lt.s32.totalorder %v100_v7, %v1676_v9  ;;  %v99_v14 = vadd.s32 488, %v1660_v1  ;;  %vm190_vm0 = vcmp.ge.s32.totalorder %v52_v10, %v1671_v8  ;;  %vm322_vm1 = vcmp.lt.s32.totalorder %v52_v10, %v1676_v9 }
  0x17   :  { %1435 = vmatpush3.msk.msra.mxu0 %vm451_vm12, %v1628_v12  ;;  %vm483_vm15 = vmand %vm223_vm7, %vm355_vm8  ;;  %v51_v15 = vadd.s32 104, %v1660_v1  ;;  %vm222_vm3 = vcmp.ge.s32.totalorder %v84_v11, %v1671_v8  ;;  %vm354_vm4 = vcmp.lt.s32.totalorder %v84_v11, %v1676_v9  ;;  %v83_v16 = vadd.s32 360, %v1660_v1 }
  0x18   :  { %1470 = vmatpush3.msk.msra.mxu1 %vm483_vm15, %v1628_v12  ;;  %vm466_vm2 = vmand %vm206_vm10, %vm338_vm11  ;;  %vm205_vm6 = vcmp.ge.s32.totalorder %v67_v13, %v1671_v8  ;;  %vm337_vm7 = vcmp.lt.s32.totalorder %v67_v13, %v1676_v9  ;;  %v66_v17 = vadd.s32 224, %v1660_v1  ;;  %vm237_vm9 = vcmp.ge.s32.totalorder %v99_v14, %v1671_v8 }
  0x19   :  { %1436 = vmatprep.subr.msk.mxu0 %vm466_vm2, %v1628_v12  ;;  %vm498_vm5 = vmand %vm238_vm13, %vm370_vm14  ;;  %vm369_vm10 = vcmp.lt.s32.totalorder %v99_v14, %v1676_v9  ;;  %v98_v18 = vadd.s32 480, %v1660_v1  ;;  %vm189_vm12 = vcmp.ge.s32.totalorder %v51_v15, %v1671_v8  ;;  %vm321_vm13 = vcmp.lt.s32.totalorder %v51_v15, %v1676_v9 }
  0x1a   :  { %1471 = vmatprep.subr.msk.mxu1 %vm498_vm5, %v1628_v12  ;;  %vm450_vm8 = vmand %vm190_vm0, %vm322_vm1  ;;  %v50_v19 = vadd.s32 96, %v1660_v1  ;;  %vm221_vm15 = vcmp.ge.s32.totalorder %v83_v16, %v1671_v8  ;;  %vm353_vm0 = vcmp.lt.s32.totalorder %v83_v16, %v1676_v9  ;;  %v82_v20 = vadd.s32 352, %v1660_v1 }
  0x1b   :  { %1437 = vmatpush3.msk.msra.mxu0 %vm450_vm8, %v1628_v12  ;;  %vm482_vm11 = vmand %vm222_vm3, %vm354_vm4  ;;  %vm204_vm2 = vcmp.ge.s32.totalorder %v66_v17, %v1671_v8  ;;  %vm336_vm3 = vcmp.lt.s32.totalorder %v66_v17, %v1676_v9  ;;  %v65_v21 = vadd.s32 216, %v1660_v1  ;;  %vm236_vm5 = vcmp.ge.s32.totalorder %v98_v18, %v1671_v8 }
  0x1c   :  { %1472 = vmatpush3.msk.msra.mxu1 %vm482_vm11, %v1628_v12  ;;  %vm465_vm14 = vmand %vm205_vm6, %vm337_vm7  ;;  %vm368_vm6 = vcmp.lt.s32.totalorder %v98_v18, %v1676_v9  ;;  %v97_v22 = vadd.s32 472, %v1660_v1  ;;  %vm188_vm8 = vcmp.ge.s32.totalorder %v50_v19, %v1671_v8  ;;  %v49_v23 = vadd.s32 88, %v1660_v1 }
  0x1d   :  { %1438 = vmatprep.subr.msk.mxu0 %vm465_vm14, %v1628_v12  ;;  %vm497_vm1 = vmand %vm237_vm9, %vm369_vm10  ;;  %vm320_vm9 = vcmp.lt.s32.totalorder %v50_v19, %v1676_v9  ;;  %vm220_vm11 = vcmp.ge.s32.totalorder %v82_v20, %v1671_v8  ;;  %v81_v24 = vadd.s32 344, %v1660_v1  ;;  %vm203_vm14 = vcmp.ge.s32.totalorder %v65_v21, %v1671_v8 }
  0x1e   :  { %1473 = vmatprep.subr.msk.mxu1 %vm497_vm1, %v1628_v12  ;;  %vm449_vm4 = vmand %vm189_vm12, %vm321_vm13  ;;  %vm352_vm12 = vcmp.lt.s32.totalorder %v82_v20, %v1676_v9  ;;  %v64_v25 = vadd.s32 208, %v1660_v1  ;;  %vm235_vm1 = vcmp.ge.s32.totalorder %v97_v22, %v1671_v8  ;;  %v96_v26 = vadd.s32 464, %v1660_v1 }
  0x1f   :  { %1439 = vmatpush3.msk.msra.mxu0 %vm449_vm4, %v1628_v12  ;;  %vm481_vm7 = vmand %vm221_vm15, %vm353_vm0  ;;  %vm335_vm15 = vcmp.lt.s32.totalorder %v65_v21, %v1676_v9  ;;  %vm187_vm4 = vcmp.ge.s32.totalorder %v49_v23, %v1671_v8  ;;  %v48_v27 = vadd.s32 80, %v1660_v1  ;;  %v80_v28 = vadd.s32 336, %v1660_v1 }
  0x20   :  { %1474 = vmatpush3.msk.msra.mxu1 %vm481_vm7, %v1628_v12  ;;  %vm464_vm10 = vmand %vm204_vm2, %vm336_vm3  ;;  %vm367_vm2 = vcmp.lt.s32.totalorder %v97_v22, %v1676_v9  ;;  %vm219_vm7 = vcmp.ge.s32.totalorder %v81_v24, %v1671_v8  ;;  %v63_v29 = vadd.s32 200, %v1660_v1  ;;  %v95_v30 = vadd.s32 456, %v1660_v1 }
  0x21   :  { %1440 = vmatprep.subr.msk.mxu0 %vm464_vm10, %v1628_v12  ;;  %vm496_vm13 = vmand %vm236_vm5, %vm368_vm6  ;;  %vm319_vm5 = vcmp.lt.s32.totalorder %v49_v23, %v1676_v9  ;;  %vm202_vm10 = vcmp.ge.s32.totalorder %v64_v25, %v1671_v8  ;;  %v47_v31 = vadd.s32 72, %v1660_v1  ;;  %v79_v32 = vadd.s32 328, %v1660_v1 }
  0x22   :  { %1475 = vmatprep.subr.msk.mxu1 %vm496_vm13, %v1628_v12  ;;  %vm448_vm0 = vmand %vm188_vm8, %vm320_vm9  ;;  %vm351_vm8 = vcmp.lt.s32.totalorder %v81_v24, %v1676_v9  ;;  %vm234_vm13 = vcmp.ge.s32.totalorder %v96_v26, %v1671_v8  ;;  %v62_v33 = vadd.s32 192, %v1660_v1  ;;  %v94_v34 = vadd.s32 448, %v1660_v1 }
  0x23   :  { %1441 = vmatpush3.msk.msra.mxu0 %vm448_vm0, %v1628_v12  ;;  %vm480_vm3 = vmand %vm220_vm11, %vm352_vm12  ;;  %vm334_vm11 = vcmp.lt.s32.totalorder %v64_v25, %v1676_v9  ;;  %vm186_vm0 = vcmp.ge.s32.totalorder %v48_v27, %v1671_v8  ;;  %v46_v35 = vadd.s32 64, %v1660_v1  ;;  %v78_v36 = vadd.s32 320, %v1660_v1 }
  0x24   :  { %1476 = vmatpush3.msk.msra.mxu1 %vm480_vm3, %v1628_v12  ;;  %vm463_vm6 = vmand %vm203_vm14, %vm335_vm15  ;;  %vm366_vm14 = vcmp.lt.s32.totalorder %v96_v26, %v1676_v9  ;;  %vm218_vm3 = vcmp.ge.s32.totalorder %v80_v28, %v1671_v8  ;;  %v61_v37 = vadd.s32 184, %v1660_v1  ;;  %v93_v38 = vadd.s32 440, %v1660_v1 }
  0x25   :  { %1442 = vmatprep.subr.msk.mxu0 %vm463_vm6, %v1628_v12  ;;  %vm495_vm9 = vmand %vm235_vm1, %vm367_vm2  ;;  %vm318_vm1 = vcmp.lt.s32.totalorder %v48_v27, %v1676_v9  ;;  %vm201_vm6 = vcmp.ge.s32.totalorder %v63_v29, %v1671_v8  ;;  %v45_v39 = vadd.s32 56, %v1660_v1  ;;  %v77_v40 = vadd.s32 312, %v1660_v1 }
  0x26   :  { %1477 = vmatprep.subr.msk.mxu1 %vm495_vm9, %v1628_v12  ;;  %vm447_vm12 = vmand %vm187_vm4, %vm319_vm5  ;;  %vm350_vm4 = vcmp.lt.s32.totalorder %v80_v28, %v1676_v9  ;;  %vm233_vm9 = vcmp.ge.s32.totalorder %v95_v30, %v1671_v8  ;;  %v60_v41 = vadd.s32 176, %v1660_v1  ;;  %v92_v42 = vadd.s32 432, %v1660_v1 }
  0x27   :  { %1443 = vmatpush3.msk.msra.mxu0 %vm447_vm12, %v1628_v12  ;;  %vm479_vm15 = vmand %vm219_vm7, %vm351_vm8  ;;  %vm333_vm7 = vcmp.lt.s32.totalorder %v63_v29, %v1676_v9  ;;  %vm185_vm12 = vcmp.ge.s32.totalorder %v47_v31, %v1671_v8  ;;  %v44_v45 = vadd.s32 48, %v1660_v1  ;;  %v76_v46 = vadd.s32 304, %v1660_v1 }
  0x28   :  { %1478 = vmatpush3.msk.msra.mxu1 %vm479_vm15, %v1628_v12  ;;  %vm462_vm2 = vmand %vm202_vm10, %vm334_vm11  ;;  %vm365_vm10 = vcmp.lt.s32.totalorder %v95_v30, %v1676_v9  ;;  %vm217_vm15 = vcmp.ge.s32.totalorder %v79_v32, %v1671_v8  ;;  %v59_v47 = vadd.s32 168, %v1660_v1  ;;  %v91_v48 = vadd.s32 424, %v1660_v1 }
  0x29   :  { %1444 = vmatprep.subr.msk.mxu0 %vm462_vm2, %v1628_v12  ;;  %vm494_vm5 = vmand %vm234_vm13, %vm366_vm14  ;;  %vm317_vm13 = vcmp.lt.s32.totalorder %v47_v31, %v1676_v9  ;;  %vm200_vm2 = vcmp.ge.s32.totalorder %v62_v33, %v1671_v8  ;;  %v826_v49 = vunpack.c.0.s8 %v825_v44  ;;  %v43_v50 = vadd.s32 40, %v1660_v1 }
  0x2a   :  { %1479 = vmatprep.subr.msk.mxu1 %vm494_vm5, %v1628_v12  ;;  %vm446_vm8 = vmand %vm186_vm0, %vm318_vm1  ;;  %vm349_vm0 = vcmp.lt.s32.totalorder %v79_v32, %v1676_v9  ;;  %vm232_vm5 = vcmp.ge.s32.totalorder %v94_v34, %v1671_v8  ;;  %v75_v51 = vadd.s32 296, %v1660_v1  ;;  %v58_v52 = vadd.s32 160, %v1660_v1 }
  0x2b   :  { %1445 = vmatpush3.msk.msra.mxu0 %vm446_vm8, %v1628_v12  ;;  %vm478_vm11 = vmand %vm218_vm3, %vm350_vm4  ;;  %vm332_vm3 = vcmp.lt.s32.totalorder %v62_v33, %v1676_v9  ;;  %vm184_vm8 = vcmp.ge.s32.totalorder %v46_v35, %v1671_v8  ;;  %v90_v53 = vadd.s32 416, %v1660_v1  ;;  %v1859_v54 = vsub.s32 %v826_v49, %v1660_v1 }
  0x2c   :  { %1480 = vmatpush3.msk.msra.mxu1 %vm478_vm11, %v1628_v12  ;;  %vm461_vm14 = vmand %vm201_vm6, %vm333_vm7  ;;  %vm364_vm6 = vcmp.lt.s32.totalorder %v94_v34, %v1676_v9  ;;  %vm216_vm11 = vcmp.ge.s32.totalorder %v78_v36, %v1671_v8  ;;  %v42_v55 = vadd.s32 32, %v1660_v1  ;;  %v74_v56 = vadd.s32 288, %v1660_v1 }
  0x2d   :  { %1446 = vmatprep.subr.msk.mxu0 %vm461_vm14, %v1628_v12  ;;  %vm493_vm1 = vmand %vm233_vm9, %vm365_vm10  ;;  %vm316_vm9 = vcmp.lt.s32.totalorder %v46_v35, %v1676_v9  ;;  %vm199_vm14 = vcmp.ge.s32.totalorder %v61_v37, %v1671_v8  ;;  %v57_v58 = vadd.s32 152, %v1660_v1  ;;  %v89_v59 = vadd.s32 408, %v1660_v1 }
  0x2e   :  { %1481 = vmatprep.subr.msk.mxu1 %vm493_vm1, %v1628_v12  ;;  %vm445_vm4 = vmand %vm185_vm12, %vm317_vm13  ;;  %vm348_vm12 = vcmp.lt.s32.totalorder %v78_v36, %v1676_v9  ;;  %vm231_vm1 = vcmp.ge.s32.totalorder %v93_v38, %v1671_v8  ;;  %v1888_v60 = vrot.slane %v35_v57, %v1859_v54  ;;  %v41_v61 = vadd.s32 24, %v1660_v1 }
  0x2f   :  { %1447 = vmatpush3.msk.msra.mxu0 %vm445_vm4, %v1628_v12  ;;  %vm477_vm7 = vmand %vm217_vm15, %vm349_vm0  ;;  %vm331_vm15 = vcmp.lt.s32.totalorder %v61_v37, %v1676_v9  ;;  %vm183_vm4 = vcmp.ge.s32.totalorder %v45_v39, %v1671_v8  ;;  %v73_v63 = vadd.s32 280, %v1660_v1  ;;  %v56_v2 = vadd.s32 144, %v1660_v1 }
  0x30   :  { %1482 = vmatpush3.msk.msra.mxu1 %vm477_vm7, %v1628_v12  ;;  %vm460_vm10 = vmand %vm200_vm2, %vm332_vm3  ;;  %vm363_vm2 = vcmp.lt.s32.totalorder %v93_v38, %v1676_v9  ;;  %vm215_vm7 = vcmp.ge.s32.totalorder %v77_v40, %v1671_v8  ;;  %v838_v0 = vcombine.high %v1888_v60, %v1888_v60  ;;  %v1917_v3 = vrot.slane %v823_v62, %v1859_v54 }
  0x31   :  { %1448 = vmatprep.subr.msk.mxu0 %vm460_vm10, %v1628_v12  ;;  %vm492_vm13 = vmand %vm232_vm5, %vm364_vm6  ;;  %vm315_vm5 = vcmp.lt.s32.totalorder %v45_v39, %v1676_v9  ;;  %vm198_vm10 = vcmp.ge.s32.totalorder %v60_v41, %v1671_v8  ;;  %v88_v4 = vadd.s32 400, %v1660_v1  ;;  %v40_v5 = vadd.s32 16, %v1660_v1 }
  0x32   :  { %1483 = vmatprep.subr.msk.mxu1 %vm492_vm13, %v1628_v12  ;;  %vm444_vm0 = vmand %vm184_vm8, %vm316_vm9  ;;  %vm347_vm8 = vcmp.lt.s32.totalorder %v77_v40, %v1676_v9  ;;  %vm230_vm13 = vcmp.ge.s32.totalorder %v92_v42, %v1671_v8  ;;  %929 = vmatprep.mubr.f32.mxu0 %v838_v0  ;;  %v839_v6 = vcombine.high %v1917_v3, %v1917_v3  ;;  %v72_v7 = vadd.s32 272, %v1660_v1  ;;  %v2214_v0 = vld [vmem:[%s2351_s1] ss:$0 sm:$0xff] }
  0x33   :  { %1449 = vmatpush3.msk.msra.mxu0 %vm444_vm0, %v1628_v12  ;;  %vm476_vm3 = vmand %vm216_vm11, %vm348_vm12  ;;  %vm330_vm11 = vcmp.lt.s32.totalorder %v60_v41, %v1676_v9  ;;  %vm182_vm0 = vcmp.ge.s32.totalorder %v44_v45, %v1671_v8  ;;  %v55_v10 = vadd.s32 136, %v1660_v1  ;;  %v87_v11 = vadd.s32 392, %v1660_v1 }
  0x34   :  { %1484 = vmatpush3.msk.msra.mxu1 %vm476_vm3, %v1628_v12  ;;  %vm459_vm6 = vmand %vm199_vm14, %vm331_vm15  ;;  %vm362_vm14 = vcmp.lt.s32.totalorder %v92_v42, %v1676_v9  ;;  %vm214_vm3 = vcmp.ge.s32.totalorder %v76_v46, %v1671_v8  ;;  %999 = vmatprep.mubr.f32.mxu1 %v839_v6  ;;  %v39_v13 = vadd.s32 8, %v1660_v1  ;;  %v71_v14 = vadd.s32 264, %v1660_v1 }
  0x35   :  { %1450 = vmatprep.subr.msk.mxu0 %vm459_vm6, %v1628_v12  ;;  %vm491_vm9 = vmand %vm231_vm1, %vm363_vm2  ;;  %vm314_vm1 = vcmp.lt.s32.totalorder %v44_v45, %v1676_v9  ;;  %vm197_vm6 = vcmp.ge.s32.totalorder %v59_v47, %v1671_v8  ;;  %v54_v15 = vadd.s32 128, %v1660_v1  ;;  %v86_v16 = vadd.s32 384, %v1660_v1 }
  0x36   :  { %1485 = vmatprep.subr.msk.mxu1 %vm491_vm9, %v1628_v12  ;;  %vm443_vm12 = vmand %vm183_vm4, %vm315_vm5  ;;  %vm346_vm4 = vcmp.lt.s32.totalorder %v76_v46, %v1676_v9  ;;  %vm229_vm9 = vcmp.ge.s32.totalorder %v91_v48, %v1671_v8  ;;  %v70_v17 = vadd.s32 256, %v1660_v1  ;;  %v133_v18 = vadd.s32 760, %v1660_v1 }
  0x37   :  { %1451 = vmatpush3.msk.msra.mxu0 %vm443_vm12, %v1628_v12  ;;  %vm475_vm15 = vmand %vm215_vm7, %vm347_vm8  ;;  %vm329_vm7 = vcmp.lt.s32.totalorder %v59_v47, %v1676_v9  ;;  %vm181_vm12 = vcmp.ge.s32.totalorder %v43_v50, %v1671_v8  ;;  %v165_v19 = vadd.s32 1016, %v1660_v1  ;;  %v117_v20 = vadd.s32 632, %v1660_v1 }
  0x38   :  { %1486 = vmatpush3.msk.msra.mxu1 %vm475_vm15, %v1628_v12  ;;  %vm458_vm2 = vmand %vm198_vm10, %vm330_vm11  ;;  %vm361_vm10 = vcmp.lt.s32.totalorder %v91_v48, %v1676_v9  ;;  %vm213_vm15 = vcmp.ge.s32.totalorder %v75_v51, %v1671_v8  ;;  %v149_v21 = vadd.s32 888, %v1660_v1  ;;  %v132_v22 = vadd.s32 752, %v1660_v1  ;;  %v36_v48 = vld [vmem:[#allocation3 + $0x8] sm:$0xff] }
  0x39   :  { %1452 = vmatprep.subr.msk.mxu0 %vm458_vm2, %v1628_v12  ;;  %vm490_vm5 = vmand %vm230_vm13, %vm362_vm14  ;;  %vm313_vm13 = vcmp.lt.s32.totalorder %v43_v50, %v1676_v9  ;;  %vm196_vm2 = vcmp.ge.s32.totalorder %v58_v52, %v1671_v8  ;;  %v164_v23 = vadd.s32 1008, %v1660_v1  ;;  %v116_v24 = vadd.s32 624, %v1660_v1 }
  0x3a   :  { %1487 = vmatprep.subr.msk.mxu1 %vm490_vm5, %v1628_v12  ;;  %vm442_vm8 = vmand %vm182_vm0, %vm314_vm1  ;;  %vm345_vm0 = vcmp.lt.s32.totalorder %v75_v51, %v1676_v9  ;;  %vm228_vm5 = vcmp.ge.s32.totalorder %v90_v53, %v1671_v8  ;;  %v148_v25 = vadd.s32 880, %v1660_v1  ;;  %v131_v26 = vadd.s32 744, %v1660_v1 }
  0x3b   :  { %1453 = vmatpush3.msk.msra.mxu0 %vm442_vm8, %v1628_v12  ;;  %vm474_vm11 = vmand %vm214_vm3, %vm346_vm4  ;;  %vm328_vm3 = vcmp.lt.s32.totalorder %v58_v52, %v1676_v9  ;;  %vm180_vm8 = vcmp.ge.s32.totalorder %v42_v55, %v1671_v8  ;;  %v163_v27 = vadd.s32 1000, %v1660_v1  ;;  %v115_v28 = vadd.s32 616, %v1660_v1 }
  0x3c   :  { %1488 = vmatpush3.msk.msra.mxu1 %vm474_vm11, %v1628_v12  ;;  %vm457_vm14 = vmand %vm197_vm6, %vm329_vm7  ;;  %vm360_vm6 = vcmp.lt.s32.totalorder %v90_v53, %v1676_v9  ;;  %vm212_vm11 = vcmp.ge.s32.totalorder %v74_v56, %v1671_v8  ;;  %v147_v29 = vadd.s32 872, %v1660_v1  ;;  %v130_v30 = vadd.s32 736, %v1660_v1 }
  0x3d   :  { %1454 = vmatprep.subr.msk.mxu0 %vm457_vm14, %v1628_v12  ;;  %vm489_vm1 = vmand %vm229_vm9, %vm361_vm10  ;;  %vm312_vm9 = vcmp.lt.s32.totalorder %v42_v55, %v1676_v9  ;;  %vm195_vm14 = vcmp.ge.s32.totalorder %v57_v58, %v1671_v8  ;;  %v162_v31 = vadd.s32 992, %v1660_v1  ;;  %v114_v32 = vadd.s32 608, %v1660_v1 }
  0x3e   :  { %1489 = vmatprep.subr.msk.mxu1 %vm489_vm1, %v1628_v12  ;;  %vm441_vm4 = vmand %vm181_vm12, %vm313_vm13  ;;  %vm344_vm12 = vcmp.lt.s32.totalorder %v74_v56, %v1676_v9  ;;  %vm227_vm1 = vcmp.ge.s32.totalorder %v89_v59, %v1671_v8  ;;  %v146_v33 = vadd.s32 864, %v1660_v1  ;;  %v129_v34 = vadd.s32 728, %v1660_v1 }
  0x3f   :  { %1455 = vmatpush3.msk.msra.mxu0 %vm441_vm4, %v1628_v12  ;;  %vm473_vm7 = vmand %vm213_vm15, %vm345_vm0  ;;  %vm327_vm15 = vcmp.lt.s32.totalorder %v57_v58, %v1676_v9  ;;  %vm179_vm4 = vcmp.ge.s32.totalorder %v41_v61, %v1671_v8  ;;  %v161_v35 = vadd.s32 984, %v1660_v1  ;;  %v113_v36 = vadd.s32 600, %v1660_v1 }
  0x40   :  { %1490 = vmatpush3.msk.msra.mxu1 %vm473_vm7, %v1628_v12  ;;  %vm456_vm10 = vmand %vm196_vm2, %vm328_vm3  ;;  %vm359_vm2 = vcmp.lt.s32.totalorder %v89_v59, %v1676_v9  ;;  %vm211_vm7 = vcmp.ge.s32.totalorder %v73_v63, %v1671_v8  ;;  %v145_v37 = vadd.s32 856, %v1660_v1  ;;  %v128_v38 = vadd.s32 720, %v1660_v1 }
  0x41   :  { %1456 = vmatprep.subr.msk.mxu0 %vm456_vm10, %v1628_v12  ;;  %vm488_vm13 = vmand %vm228_vm5, %vm360_vm6  ;;  %vm311_vm5 = vcmp.lt.s32.totalorder %v41_v61, %v1676_v9  ;;  %vm194_vm10 = vcmp.ge.s32.totalorder %v56_v2, %v1671_v8  ;;  %v160_v39 = vadd.s32 976, %v1660_v1  ;;  %v112_v40 = vadd.s32 592, %v1660_v1 }
  0x42   :  { %1491 = vmatprep.subr.msk.mxu1 %vm488_vm13, %v1628_v12  ;;  %vm440_vm0 = vmand %vm180_vm8, %vm312_vm9  ;;  %vm343_vm8 = vcmp.lt.s32.totalorder %v73_v63, %v1676_v9  ;;  %vm226_vm13 = vcmp.ge.s32.totalorder %v88_v4, %v1671_v8  ;;  %v144_v41 = vadd.s32 848, %v1660_v1  ;;  %v127_v42 = vadd.s32 712, %v1660_v1 }
  0x43   :  { %1457 = vmatpush3.msk.msra.mxu0 %vm440_vm0, %v1628_v12  ;;  %vm472_vm3 = vmand %vm212_vm11, %vm344_vm12  ;;  %vm326_vm11 = vcmp.lt.s32.totalorder %v56_v2, %v1676_v9  ;;  %vm178_vm0 = vcmp.ge.s32.totalorder %v40_v5, %v1671_v8  ;;  %v159_v43 = vadd.s32 968, %v1660_v1  ;;  %v111_v44 = vadd.s32 584, %v1660_v1  ;;  %v2220_v2 = vld [vmem:[%s2352_s2] ss:$0 sm:$0xff] }
  0x44   :  { %1492 = vmatpush3.msk.msra.mxu1 %vm472_vm3, %v1628_v12  ;;  %vm455_vm6 = vmand %vm195_vm14, %vm327_vm15  ;;  %vm358_vm14 = vcmp.lt.s32.totalorder %v88_v4, %v1676_v9  ;;  %vm210_vm3 = vcmp.ge.s32.totalorder %v72_v7, %v1671_v8  ;;  %v143_v45 = vadd.s32 840, %v1660_v1  ;;  %v126_v46 = vadd.s32 704, %v1660_v1 }
  0x45   :  { %1458 = vmatprep.subr.msk.mxu0 %vm455_vm6, %v1628_v12  ;;  %vm487_vm9 = vmand %vm227_vm1, %vm359_vm2  ;;  %vm310_vm1 = vcmp.lt.s32.totalorder %v40_v5, %v1676_v9  ;;  %vm193_vm6 = vcmp.ge.s32.totalorder %v55_v10, %v1671_v8  ;;  %v158_v47 = vadd.s32 960, %v1660_v1  ;;  %v110_v49 = vadd.s32 576, %v1660_v1 }
  0x46   :  { %1493 = vmatprep.subr.msk.mxu1 %vm487_vm9, %v1628_v12  ;;  %vm439_vm12 = vmand %vm179_vm4, %vm311_vm5  ;;  %vm342_vm4 = vcmp.lt.s32.totalorder %v72_v7, %v1676_v9  ;;  %vm225_vm9 = vcmp.ge.s32.totalorder %v87_v11, %v1671_v8  ;;  %v142_v50 = vadd.s32 832, %v1660_v1  ;;  %v125_v51 = vadd.s32 696, %v1660_v1 }
  0x47   :  { %1459 = vmatpush3.msk.msra.mxu0 %vm439_vm12, %v1628_v12  ;;  %vm471_vm15 = vmand %vm211_vm7, %vm343_vm8  ;;  %vm325_vm7 = vcmp.lt.s32.totalorder %v55_v10, %v1676_v9  ;;  %vm177_vm12 = vcmp.ge.s32.totalorder %v39_v13, %v1671_v8  ;;  %v2145_v52 = vrot.slane %v36_v48, %v1859_v54  ;;  %v840_v53 = vcombine.high %v36_v48, %v36_v48 }
  0x48   :  { %1494 = vmatpush3.msk.msra.mxu1 %vm471_vm15, %v1628_v12  ;;  %vm454_vm2 = vmand %vm194_vm10, %vm326_vm11  ;;  %vm357_vm10 = vcmp.lt.s32.totalorder %v87_v11, %v1676_v9  ;;  %vm209_vm15 = vcmp.ge.s32.totalorder %v71_v14, %v1671_v8  ;;  %v157_v55 = vadd.s32 952, %v1660_v1  ;;  %v109_v56 = vadd.s32 568, %v1660_v1 }
  0x49   :  { %1460 = vmatprep.subr.msk.mxu0 %vm454_vm2, %v1628_v12  ;;  %vm486_vm5 = vmand %vm226_vm13, %vm358_vm14  ;;  %vm309_vm13 = vcmp.lt.s32.totalorder %v39_v13, %v1676_v9  ;;  %vm192_vm2 = vcmp.ge.s32.totalorder %v54_v15, %v1671_v8  ;;  %v141_v57 = vadd.s32 824, %v1660_v1  ;;  %v855_v58 = vcombine.high %v2145_v52, %v2145_v52 }
  0x4a   :  { %1495 = vmatprep.subr.msk.mxu1 %vm486_vm5, %v1628_v12  ;;  %vm438_vm8 = vmand %vm178_vm0, %vm310_vm1  ;;  %vm341_vm0 = vcmp.lt.s32.totalorder %v71_v14, %v1676_v9  ;;  %vm224_vm5 = vcmp.ge.s32.totalorder %v86_v16, %v1671_v8  ;;  %v124_v59 = vadd.s32 688, %v1660_v1  ;;  %v156_v61 = vadd.s32 944, %v1660_v1 }
  0x4b   :  { %1461 = vmatpush3.msk.msra.mxu0 %vm438_vm8, %v1628_v12  ;;  %vm470_vm11 = vmand %vm210_vm3, %vm342_vm4  ;;  %vm324_vm3 = vcmp.lt.s32.totalorder %v54_v15, %v1676_v9  ;;  %vm176_vm8 = vcmp.ge.s32.totalorder %v1660_v1, %v1671_v8  ;;  %v140_v63 = vadd.s32 816, %v1660_v1  ;;  %v155_v4 = vadd.s32 936, %v1660_v1 }
  0x4c   :  { %1496 = vmatpush3.msk.msra.mxu1 %vm470_vm11, %v1628_v12  ;;  %vm453_vm14 = vmand %vm193_vm6, %vm325_vm7  ;;  %vm356_vm6 = vcmp.lt.s32.totalorder %v86_v16, %v1676_v9  ;;  %vm208_vm11 = vcmp.ge.s32.totalorder %v70_v17, %v1671_v8  ;;  %v107_v5 = vadd.s32 552, %v1660_v1  ;;  %v154_v6 = vadd.s32 928, %v1660_v1 }
  0x4d   :  { %1462 = vmatprep.subr.msk.mxu0 %vm453_vm14, %v1628_v12  ;;  %vm485_vm1 = vmand %vm225_vm9, %vm357_vm10  ;;  %vm308_vm9 = vcmp.lt.s32.totalorder %v1660_v1, %v1676_v9  ;;  %vm271_vm14 = vcmp.ge.s32.totalorder %v133_v18, %v1671_v8  ;;  %v106_v7 = vadd.s32 544, %v1660_v1  ;;  %v138_v10 = vadd.s32 800, %v1660_v1 }
  0x4e   :  { %1497 = vmatprep.subr.msk.mxu1 %vm485_vm1, %v1628_v12  ;;  %vm437_vm4 = vmand %vm177_vm12, %vm309_vm13  ;;  %vm340_vm12 = vcmp.lt.s32.totalorder %v70_v17, %v1676_v9  ;;  %vm303_vm1 = vcmp.ge.s32.totalorder %v165_v19, %v1671_v8  ;;  %v121_v11 = vadd.s32 664, %v1660_v1  ;;  %v153_v13 = vadd.s32 920, %v1660_v1 }
  0x4f   :  { %1463 = vmatpush3.msk.msra.mxu0 %vm437_vm4, %v1628_v12  ;;  %vm469_vm7 = vmand %vm209_vm15, %vm341_vm0  ;;  %vm403_vm15 = vcmp.lt.s32.totalorder %v133_v18, %v1676_v9  ;;  %vm255_vm4 = vcmp.ge.s32.totalorder %v117_v20, %v1671_v8  ;;  %v105_v14 = vadd.s32 536, %v1660_v1  ;;  %v137_v15 = vadd.s32 792, %v1660_v1 }
  0x50   :  { %1498 = vmatpush3.msk.msra.mxu1 %vm469_vm7, %v1628_v12  ;;  %vm452_vm10 = vmand %vm192_vm2, %vm324_vm3  ;;  %vm435_vm2 = vcmp.lt.s32.totalorder %v165_v19, %v1676_v9  ;;  %vm287_vm7 = vcmp.ge.s32.totalorder %v149_v21, %v1671_v8  ;;  %v120_v16 = vadd.s32 656, %v1660_v1  ;;  %v152_v17 = vadd.s32 912, %v1660_v1 }
  0x51   :  { %1464 = vmatprep.subr.msk.mxu0 %vm452_vm10, %v1628_v12  ;;  %vm484_vm13 = vmand %vm224_vm5, %vm356_vm6  ;;  %vm387_vm5 = vcmp.lt.s32.totalorder %v117_v20, %v1676_v9  ;;  %vm270_vm10 = vcmp.ge.s32.totalorder %v132_v22, %v1671_v8  ;;  %v104_v18 = vadd.s32 528, %v1660_v1  ;;  %v136_v19 = vadd.s32 784, %v1660_v1 }
  0x52   :  { %1499 = vmatprep.subr.msk.mxu1 %vm484_vm13, %v1628_v12  ;;  %vm436_vm0 = vmand %vm176_vm8, %vm308_vm9  ;;  %vm419_vm8 = vcmp.lt.s32.totalorder %v149_v21, %v1676_v9  ;;  %vm302_vm13 = vcmp.ge.s32.totalorder %v164_v23, %v1671_v8  ;;  %v119_v20 = vadd.s32 648, %v1660_v1  ;;  %v151_v21 = vadd.s32 904, %v1660_v1 }
  0x53   :  { %1465 = vmatpush3.msk.msra.mxu0 %vm436_vm0, %v1628_v12  ;;  %vm468_vm3 = vmand %vm208_vm11, %vm340_vm12  ;;  %vm402_vm11 = vcmp.lt.s32.totalorder %v132_v22, %v1676_v9  ;;  %vm254_vm0 = vcmp.ge.s32.totalorder %v116_v24, %v1671_v8  ;;  %v103_v22 = vadd.s32 520, %v1660_v1 }
  0x54   :  { %1500 = vmatpush3.msk.msra.mxu1 %vm468_vm3, %v1628_v12  ;;  %930 = vmatmul.mubr.f32.vlgmr.msra.gmra.mxu0 %v1888_v60  ;;  %vm531_vm6 = vmand %vm271_vm14, %vm403_vm15  ;;  %vm434_vm14 = vcmp.lt.s32.totalorder %v164_v23, %v1676_v9  ;;  %vm286_vm3 = vcmp.ge.s32.totalorder %v148_v25, %v1671_v8  ;;  %v2178_v60 = vrot.slane %v840_v53, %v1859_v54  ;;  %v108_v54 = vadd.s32 560, %v1660_v1 }
  0x55   :  { %1000 = vmatmul.mubr.f32.vlgmr.msra.gmra.mxu1 %v1917_v3  ;;  %1504 = vmatprep.subr.msk.mxu0 %vm531_vm6, %v1628_v12  ;;  %vm563_vm9 = vmand %vm303_vm1, %vm435_vm2  ;;  %vm386_vm1 = vcmp.lt.s32.totalorder %v116_v24, %v1676_v9  ;;  %vm269_vm6 = vcmp.ge.s32.totalorder %v131_v26, %v1671_v8  ;;  %v123_v3 = vadd.s32 680, %v1660_v1  ;;  %v135_v23 = vadd.s32 776, %v1660_v1 }
  0x56   :  { %1539 = vmatprep.subr.msk.mxu1 %vm563_vm9, %v1628_v12  ;;  %vm515_vm12 = vmand %vm255_vm4, %vm387_vm5  ;;  %vm418_vm4 = vcmp.lt.s32.totalorder %v148_v25, %v1676_v9  ;;  %vm301_vm9 = vcmp.ge.s32.totalorder %v163_v27, %v1671_v8  ;;  %1069 = vmatprep.mubr.f32.mxu0 %v855_v58  ;;  %v856_v62 = vcombine.high %v2178_v60, %v2178_v60  ;;  %v118_v24 = vadd.s32 640, %v1660_v1 }
  0x57   :  { %1505 = vmatpush3.msk.msra.mxu0 %vm515_vm12, %v1628_v12  ;;  %vm547_vm15 = vmand %vm287_vm7, %vm419_vm8  ;;  %vm401_vm7 = vcmp.lt.s32.totalorder %v131_v26, %v1676_v9  ;;  %vm253_vm12 = vcmp.ge.s32.totalorder %v115_v28, %v1671_v8  ;;  %v150_v25 = vadd.s32 896, %v1660_v1  ;;  %v102_v26 = vadd.s32 512, %v1660_v1 }
  0x58   :  { %1540 = vmatpush3.msk.msra.mxu1 %vm547_vm15, %v1628_v12  ;;  %vm530_vm2 = vmand %vm270_vm10, %vm402_vm11  ;;  %vm433_vm10 = vcmp.lt.s32.totalorder %v163_v27, %v1676_v9  ;;  %vm285_vm15 = vcmp.ge.s32.totalorder %v147_v29, %v1671_v8  ;;  %1139 = vmatprep.mubr.f32.mxu1 %v856_v62  ;;  %v134_v27 = vadd.s32 768, %v1660_v1 }
  0x59   :  { %1506 = vmatprep.subr.msk.mxu0 %vm530_vm2, %v1628_v12  ;;  %vm562_vm5 = vmand %vm302_vm13, %vm434_vm14  ;;  %vm385_vm13 = vcmp.lt.s32.totalorder %v115_v28, %v1676_v9  ;;  %vm268_vm2 = vcmp.ge.s32.totalorder %v130_v30, %v1671_v8 }
  0x5a   :  { %1541 = vmatprep.subr.msk.mxu1 %vm562_vm5, %v1628_v12  ;;  %vm514_vm8 = vmand %vm254_vm0, %vm386_vm1  ;;  %vm417_vm0 = vcmp.lt.s32.totalorder %v147_v29, %v1676_v9  ;;  %vm300_vm5 = vcmp.ge.s32.totalorder %v162_v31, %v1671_v8 }
  0x5b   :  { %1507 = vmatpush3.msk.msra.mxu0 %vm514_vm8, %v1628_v12  ;;  %vm546_vm11 = vmand %vm286_vm3, %vm418_vm4  ;;  %vm400_vm3 = vcmp.lt.s32.totalorder %v130_v30, %v1676_v9  ;;  %vm252_vm8 = vcmp.ge.s32.totalorder %v114_v32, %v1671_v8 }
  0x5c   :  { %1542 = vmatpush3.msk.msra.mxu1 %vm546_vm11, %v1628_v12  ;;  %vm529_vm14 = vmand %vm269_vm6, %vm401_vm7  ;;  %vm432_vm6 = vcmp.lt.s32.totalorder %v162_v31, %v1676_v9  ;;  %vm284_vm11 = vcmp.ge.s32.totalorder %v146_v33, %v1671_v8 }
  0x5d   :  { %1508 = vmatprep.subr.msk.mxu0 %vm529_vm14, %v1628_v12  ;;  %vm561_vm1 = vmand %vm301_vm9, %vm433_vm10  ;;  %vm384_vm9 = vcmp.lt.s32.totalorder %v114_v32, %v1676_v9  ;;  %vm267_vm14 = vcmp.ge.s32.totalorder %v129_v34, %v1671_v8 }
  0x5e   :  { %1543 = vmatprep.subr.msk.mxu1 %vm561_vm1, %v1628_v12  ;;  %vm513_vm4 = vmand %vm253_vm12, %vm385_vm13  ;;  %vm416_vm12 = vcmp.lt.s32.totalorder %v146_v33, %v1676_v9  ;;  %vm299_vm1 = vcmp.ge.s32.totalorder %v161_v35, %v1671_v8 }
  0x5f   :  { %1509 = vmatpush3.msk.msra.mxu0 %vm513_vm4, %v1628_v12  ;;  %vm545_vm7 = vmand %vm285_vm15, %vm417_vm0  ;;  %vm399_vm15 = vcmp.lt.s32.totalorder %v129_v34, %v1676_v9  ;;  %vm251_vm4 = vcmp.ge.s32.totalorder %v113_v36, %v1671_v8 }
  0x60   :  { %1544 = vmatpush3.msk.msra.mxu1 %vm545_vm7, %v1628_v12  ;;  %vm528_vm10 = vmand %vm268_vm2, %vm400_vm3  ;;  %vm431_vm2 = vcmp.lt.s32.totalorder %v161_v35, %v1676_v9  ;;  %vm283_vm7 = vcmp.ge.s32.totalorder %v145_v37, %v1671_v8 }
  0x61   :  { %1510 = vmatprep.subr.msk.mxu0 %vm528_vm10, %v1628_v12  ;;  %vm560_vm13 = vmand %vm300_vm5, %vm432_vm6  ;;  %vm383_vm5 = vcmp.lt.s32.totalorder %v113_v36, %v1676_v9  ;;  %vm266_vm10 = vcmp.ge.s32.totalorder %v128_v38, %v1671_v8 }
  0x62   :  { %1545 = vmatprep.subr.msk.mxu1 %vm560_vm13, %v1628_v12  ;;  %vm512_vm0 = vmand %vm252_vm8, %vm384_vm9  ;;  %vm415_vm8 = vcmp.lt.s32.totalorder %v145_v37, %v1676_v9  ;;  %vm298_vm13 = vcmp.ge.s32.totalorder %v160_v39, %v1671_v8 }
  0x63   :  { %1511 = vmatpush3.msk.msra.mxu0 %vm512_vm0, %v1628_v12  ;;  %vm544_vm3 = vmand %vm284_vm11, %vm416_vm12  ;;  %vm398_vm11 = vcmp.lt.s32.totalorder %v128_v38, %v1676_v9  ;;  %vm250_vm0 = vcmp.ge.s32.totalorder %v112_v40, %v1671_v8 }
  0x64   :  { %1546 = vmatpush3.msk.msra.mxu1 %vm544_vm3, %v1628_v12  ;;  %vm527_vm6 = vmand %vm267_vm14, %vm399_vm15  ;;  %vm430_vm14 = vcmp.lt.s32.totalorder %v160_v39, %v1676_v9  ;;  %vm282_vm3 = vcmp.ge.s32.totalorder %v144_v41, %v1671_v8 }
  0x65   :  { %1512 = vmatprep.subr.msk.mxu0 %vm527_vm6, %v1628_v12  ;;  %vm559_vm9 = vmand %vm299_vm1, %vm431_vm2  ;;  %vm382_vm1 = vcmp.lt.s32.totalorder %v112_v40, %v1676_v9  ;;  %vm265_vm6 = vcmp.ge.s32.totalorder %v127_v42, %v1671_v8 }
  0x66   :  { %1547 = vmatprep.subr.msk.mxu1 %vm559_vm9, %v1628_v12  ;;  %vm511_vm12 = vmand %vm251_vm4, %vm383_vm5  ;;  %vm414_vm4 = vcmp.lt.s32.totalorder %v144_v41, %v1676_v9  ;;  %vm297_vm9 = vcmp.ge.s32.totalorder %v159_v43, %v1671_v8 }
  0x67   :  { %1513 = vmatpush3.msk.msra.mxu0 %vm511_vm12, %v1628_v12  ;;  %vm543_vm15 = vmand %vm283_vm7, %vm415_vm8  ;;  %vm397_vm7 = vcmp.lt.s32.totalorder %v127_v42, %v1676_v9  ;;  %vm249_vm12 = vcmp.ge.s32.totalorder %v111_v44, %v1671_v8 }
  0x68   :  { %1548 = vmatpush3.msk.msra.mxu1 %vm543_vm15, %v1628_v12  ;;  %vm526_vm2 = vmand %vm266_vm10, %vm398_vm11  ;;  %vm429_vm10 = vcmp.lt.s32.totalorder %v159_v43, %v1676_v9  ;;  %vm281_vm15 = vcmp.ge.s32.totalorder %v143_v45, %v1671_v8 }
  0x69   :  { %1514 = vmatprep.subr.msk.mxu0 %vm526_vm2, %v1628_v12  ;;  %vm558_vm5 = vmand %vm298_vm13, %vm430_vm14  ;;  %vm381_vm13 = vcmp.lt.s32.totalorder %v111_v44, %v1676_v9  ;;  %vm264_vm2 = vcmp.ge.s32.totalorder %v126_v46, %v1671_v8  ;;  %v1433_v44 = vld [vmem:[%s2353_s3] ss:$0 sm:$0xff] }
  0x6a   :  { %1549 = vmatprep.subr.msk.mxu1 %vm558_vm5, %v1628_v12  ;;  %vm510_vm8 = vmand %vm250_vm0, %vm382_vm1  ;;  %vm413_vm0 = vcmp.lt.s32.totalorder %v143_v45, %v1676_v9  ;;  %vm296_vm5 = vcmp.ge.s32.totalorder %v158_v47, %v1671_v8 }
  0x6b   :  { %1515 = vmatpush3.msk.msra.mxu0 %vm510_vm8, %v1628_v12  ;;  %vm542_vm11 = vmand %vm282_vm3, %vm414_vm4  ;;  %vm396_vm3 = vcmp.lt.s32.totalorder %v126_v46, %v1676_v9  ;;  %vm248_vm8 = vcmp.ge.s32.totalorder %v110_v49, %v1671_v8 }
  0x6c   :  { %1550 = vmatpush3.msk.msra.mxu1 %vm542_vm11, %v1628_v12  ;;  %vm525_vm14 = vmand %vm265_vm6, %vm397_vm7  ;;  %vm428_vm6 = vcmp.lt.s32.totalorder %v158_v47, %v1676_v9  ;;  %vm280_vm11 = vcmp.ge.s32.totalorder %v142_v50, %v1671_v8 }
  0x6d   :  { %1516 = vmatprep.subr.msk.mxu0 %vm525_vm14, %v1628_v12  ;;  %vm557_vm1 = vmand %vm297_vm9, %vm429_vm10  ;;  %vm380_vm9 = vcmp.lt.s32.totalorder %v110_v49, %v1676_v9  ;;  %vm263_vm14 = vcmp.ge.s32.totalorder %v125_v51, %v1671_v8 }
  0x6e   :  { %1551 = vmatprep.subr.msk.mxu1 %vm557_vm1, %v1628_v12  ;;  %vm509_vm4 = vmand %vm249_vm12, %vm381_vm13  ;;  %vm412_vm12 = vcmp.lt.s32.totalorder %v142_v50, %v1676_v9  ;;  %vm295_vm1 = vcmp.ge.s32.totalorder %v157_v55, %v1671_v8 }
  0x6f   :  { %1517 = vmatpush3.msk.msra.mxu0 %vm509_vm4, %v1628_v12  ;;  %vm541_vm7 = vmand %vm281_vm15, %vm413_vm0  ;;  %vm395_vm15 = vcmp.lt.s32.totalorder %v125_v51, %v1676_v9  ;;  %vm247_vm4 = vcmp.ge.s32.totalorder %v109_v56, %v1671_v8 }
  0x70   :  { %1552 = vmatpush3.msk.msra.mxu1 %vm541_vm7, %v1628_v12  ;;  %vm524_vm10 = vmand %vm264_vm2, %vm396_vm3  ;;  %vm427_vm2 = vcmp.lt.s32.totalorder %v157_v55, %v1676_v9  ;;  %vm279_vm7 = vcmp.ge.s32.totalorder %v141_v57, %v1671_v8  ;;  %v122_v8 = vadd.s32 672, %v1660_v1 }
  0x71   :  { %1518 = vmatprep.subr.msk.mxu0 %vm524_vm10, %v1628_v12  ;;  %vm556_vm13 = vmand %vm296_vm5, %vm428_vm6  ;;  %vm379_vm5 = vcmp.lt.s32.totalorder %v109_v56, %v1676_v9  ;;  %vm262_vm10 = vcmp.ge.s32.totalorder %v124_v59, %v2214_v0 }
  0x72   :  { %1553 = vmatprep.subr.msk.mxu1 %vm556_vm13, %v1628_v12  ;;  %vm508_vm0 = vmand %vm248_vm8, %vm380_vm9  ;;  %vm411_vm8 = vcmp.lt.s32.totalorder %v141_v57, %v1676_v9  ;;  %vm294_vm13 = vcmp.ge.s32.totalorder %v156_v61, %v2214_v0  ;;  %v139_v9 = vadd.s32 808, %v1660_v1  ;;  %v1630_v1 = vmov 0.0  }
  0x73   :  { %1519 = vmatpush3.msk.msra.mxu0 %vm508_vm0, %v1628_v12  ;;  %vm540_vm3 = vmand %vm280_vm11, %vm412_vm12  ;;  %vm394_vm11 = vcmp.lt.s32.totalorder %v124_v59, %v2220_v2  ;;  %vm246_vm0 = vcmp.ge.s32.totalorder %v108_v54, %v2214_v0  ;;  %34 = vst [vmem:[#allocation2] sm:$0x3] %v1630_v1 }
  0x74   :  { %1554 = vmatpush3.msk.msra.mxu1 %vm540_vm3, %v1628_v12  ;;  %vm523_vm6 = vmand %vm263_vm14, %vm395_vm15  ;;  %vm426_vm14 = vcmp.lt.s32.totalorder %v156_v61, %v2220_v2  ;;  %vm278_vm3 = vcmp.ge.s32.totalorder %v140_v63, %v2214_v0 }
  0x75   :  { %1520 = vmatprep.subr.msk.mxu0 %vm523_vm6, %v1628_v12  ;;  %vm555_vm9 = vmand %vm295_vm1, %vm427_vm2  ;;  %vm378_vm1 = vcmp.lt.s32.totalorder %v108_v54, %v2220_v2  ;;  %vm261_vm6 = vcmp.ge.s32.totalorder %v123_v3, %v2214_v0 }
  0x76   :  { %1555 = vmatprep.subr.msk.mxu1 %vm555_vm9, %v1628_v12  ;;  %vm507_vm12 = vmand %vm247_vm4, %vm379_vm5  ;;  %vm410_vm4 = vcmp.lt.s32.totalorder %v140_v63, %v2220_v2  ;;  %vm293_vm9 = vcmp.ge.s32.totalorder %v155_v4, %v2214_v0 }
  0x77   :  { %1521 = vmatpush3.msk.msra.mxu0 %vm507_vm12, %v1628_v12  ;;  %vm539_vm15 = vmand %vm279_vm7, %vm411_vm8  ;;  %vm393_vm7 = vcmp.lt.s32.totalorder %v123_v3, %v2220_v2  ;;  %vm245_vm12 = vcmp.ge.s32.totalorder %v107_v5, %v2214_v0 }
  0x78   :  { %1556 = vmatpush3.msk.msra.mxu1 %vm539_vm15, %v1628_v12  ;;  %vm522_vm2 = vmand %vm262_vm10, %vm394_vm11  ;;  %vm425_vm10 = vcmp.lt.s32.totalorder %v155_v4, %v2220_v2  ;;  %vm277_vm15 = vcmp.ge.s32.totalorder %v139_v9, %v2214_v0 }
  0x79   :  { %1522 = vmatprep.subr.msk.mxu0 %vm522_vm2, %v1628_v12  ;;  %vm554_vm5 = vmand %vm294_vm13, %vm426_vm14  ;;  %vm377_vm13 = vcmp.lt.s32.totalorder %v107_v5, %v2220_v2  ;;  %vm260_vm2 = vcmp.ge.s32.totalorder %v122_v8, %v2214_v0 }
  0x7a   :  { %1557 = vmatprep.subr.msk.mxu1 %vm554_vm5, %v1628_v12  ;;  %vm506_vm8 = vmand %vm246_vm0, %vm378_vm1  ;;  %vm409_vm0 = vcmp.lt.s32.totalorder %v139_v9, %v2220_v2  ;;  %vm292_vm5 = vcmp.ge.s32.totalorder %v154_v6, %v2214_v0  ;;  %v820_v41 = vld [vmem:[#allocation2] sm:$0x3] }
  0x7b   :  { %1523 = vmatpush3.msk.msra.mxu0 %vm506_vm8, %v1628_v12  ;;  %vm538_vm11 = vmand %vm278_vm3, %vm410_vm4  ;;  %vm392_vm3 = vcmp.lt.s32.totalorder %v122_v8, %v2220_v2  ;;  %vm244_vm8 = vcmp.ge.s32.totalorder %v106_v7, %v2214_v0 }
  0x7c   :  { %1558 = vmatpush3.msk.msra.mxu1 %vm538_vm11, %v1628_v12  ;;  %vm521_vm14 = vmand %vm261_vm6, %vm393_vm7  ;;  %vm424_vm6 = vcmp.lt.s32.totalorder %v154_v6, %v2220_v2  ;;  %vm276_vm11 = vcmp.ge.s32.totalorder %v138_v10, %v2214_v0 }
  0x7d   :  { %1524 = vmatprep.subr.msk.mxu0 %vm521_vm14, %v1628_v12  ;;  %vm553_vm1 = vmand %vm293_vm9, %vm425_vm10  ;;  %vm376_vm9 = vcmp.lt.s32.totalorder %v106_v7, %v2220_v2  ;;  %vm259_vm14 = vcmp.ge.s32.totalorder %v121_v11, %v2214_v0 }
  0x7e   :  { %1559 = vmatprep.subr.msk.mxu1 %vm553_vm1, %v1628_v12  ;;  %vm505_vm4 = vmand %vm245_vm12, %vm377_vm13  ;;  %vm408_vm12 = vcmp.lt.s32.totalorder %v138_v10, %v2220_v2  ;;  %vm291_vm1 = vcmp.ge.s32.totalorder %v153_v13, %v2214_v0 }
  0x7f   :  { %1525 = vmatpush3.msk.msra.mxu0 %vm505_vm4, %v1628_v12  ;;  %vm537_vm7 = vmand %vm277_vm15, %vm409_vm0  ;;  %vm391_vm15 = vcmp.lt.s32.totalorder %v121_v11, %v2220_v2  ;;  %vm243_vm4 = vcmp.ge.s32.totalorder %v105_v14, %v2214_v0 }
  0x80   :  { %1560 = vmatpush3.msk.msra.mxu1 %vm537_vm7, %v1628_v12  ;;  %vm520_vm10 = vmand %vm260_vm2, %vm392_vm3  ;;  %vm423_vm2 = vcmp.lt.s32.totalorder %v153_v13, %v2220_v2  ;;  %vm275_vm7 = vcmp.ge.s32.totalorder %v137_v15, %v2214_v0 }
  0x81   :  { %1526 = vmatprep.subr.msk.mxu0 %vm520_vm10, %v1628_v12  ;;  %vm552_vm13 = vmand %vm292_vm5, %vm424_vm6  ;;  %vm375_vm5 = vcmp.lt.s32.totalorder %v105_v14, %v2220_v2  ;;  %vm258_vm10 = vcmp.ge.s32.totalorder %v120_v16, %v2214_v0 }
  0x82   :  { %1561 = vmatprep.subr.msk.mxu1 %vm552_vm13, %v1628_v12  ;;  %vm504_vm0 = vmand %vm244_vm8, %vm376_vm9  ;;  %vm407_vm8 = vcmp.lt.s32.totalorder %v137_v15, %v2220_v2  ;;  %vm290_vm13 = vcmp.ge.s32.totalorder %v152_v17, %v2214_v0 }
  0x83   :  { %1527 = vmatpush3.msk.msra.mxu0 %vm504_vm0, %v1628_v12  ;;  %vm536_vm3 = vmand %vm276_vm11, %vm408_vm12  ;;  %vm390_vm11 = vcmp.lt.s32.totalorder %v120_v16, %v2220_v2  ;;  %vm242_vm0 = vcmp.ge.s32.totalorder %v104_v18, %v2214_v0 }
  0x84   :  { %1562 = vmatpush3.msk.msra.mxu1 %vm536_vm3, %v1628_v12  ;;  %vm519_vm6 = vmand %vm259_vm14, %vm391_vm15  ;;  %vm422_vm14 = vcmp.lt.s32.totalorder %v152_v17, %v2220_v2  ;;  %vm274_vm3 = vcmp.ge.s32.totalorder %v136_v19, %v2214_v0 }
  0x85   :  { %1528 = vmatprep.subr.msk.mxu0 %vm519_vm6, %v1628_v12  ;;  %vm551_vm9 = vmand %vm291_vm1, %vm423_vm2  ;;  %vm374_vm1 = vcmp.lt.s32.totalorder %v104_v18, %v2220_v2  ;;  %vm257_vm6 = vcmp.ge.s32.totalorder %v119_v20, %v2214_v0 }
  0x86   :  { %1563 = vmatprep.subr.msk.mxu1 %vm551_vm9, %v1628_v12  ;;  %vm503_vm12 = vmand %vm243_vm4, %vm375_vm5  ;;  %vm406_vm4 = vcmp.lt.s32.totalorder %v136_v19, %v2220_v2  ;;  %vm289_vm9 = vcmp.ge.s32.totalorder %v151_v21, %v2214_v0 }
  0x87   :  { %1529 = vmatpush3.msk.msra.mxu0 %vm503_vm12, %v1628_v12  ;;  %vm535_vm15 = vmand %vm275_vm7, %vm407_vm8  ;;  %vm389_vm7 = vcmp.lt.s32.totalorder %v119_v20, %v2220_v2  ;;  %vm241_vm12 = vcmp.ge.s32.totalorder %v103_v22, %v2214_v0 }
  0x88   :  { %1564 = vmatpush3.msk.msra.mxu1 %vm535_vm15, %v1628_v12  ;;  %vm518_vm2 = vmand %vm258_vm10, %vm390_vm11  ;;  %vm421_vm10 = vcmp.lt.s32.totalorder %v151_v21, %v2220_v2  ;;  %vm273_vm15 = vcmp.ge.s32.totalorder %v135_v23, %v2214_v0 }
  0x89   :  { %1530 = vmatprep.subr.msk.mxu0 %vm518_vm2, %v1628_v12  ;;  %vm550_vm5 = vmand %vm290_vm13, %vm422_vm14  ;;  %vm373_vm13 = vcmp.lt.s32.totalorder %v103_v22, %v2220_v2  ;;  %vm256_vm2 = vcmp.ge.s32.totalorder %v118_v24, %v2214_v0 }
  0x8a   :  { %1565 = vmatprep.subr.msk.mxu1 %vm550_vm5, %v1628_v12  ;;  %vm502_vm8 = vmand %vm242_vm0, %vm374_vm1  ;;  %vm405_vm0 = vcmp.lt.s32.totalorder %v135_v23, %v2220_v2  ;;  %vm288_vm5 = vcmp.ge.s32.totalorder %v150_v25, %v2214_v0 }
  0x8b   :  { %1531 = vmatpush3.msk.msra.mxu0 %vm502_vm8, %v1628_v12  ;;  %vm534_vm11 = vmand %vm274_vm3, %vm406_vm4  ;;  %vm388_vm3 = vcmp.lt.s32.totalorder %v118_v24, %v2220_v2  ;;  %vm240_vm8 = vcmp.ge.s32.totalorder %v102_v26, %v2214_v0 }
  0x8c   :  { %1566 = vmatpush3.msk.msra.mxu1 %vm534_vm11, %v1628_v12  ;;  %vm517_vm14 = vmand %vm257_vm6, %vm389_vm7  ;;  %vm420_vm6 = vcmp.lt.s32.totalorder %v150_v25, %v2220_v2  ;;  %vm372_vm11 = vcmp.lt.s32.totalorder %v102_v26, %v2220_v2 }
  0x8d   :  { %1532 = vmatprep.subr.msk.mxu0 %vm517_vm14, %v1628_v12  ;;  %vm549_vm1 = vmand %vm289_vm9, %vm421_vm10  ;;  %vm272_vm10 = vcmp.ge.s32.totalorder %v134_v27, %v2214_v0  ;;  %vm404_vm14 = vcmp.lt.s32.totalorder %v134_v27, %v2220_v2 }
  0x8e   :  { %1567 = vmatprep.subr.msk.mxu1 %vm549_vm1, %v1628_v12  ;;  %vm501_vm4 = vmand %vm241_vm12, %vm373_vm13 }
  0x8f   :  { %1533 = vmatpush3.msk.msra.mxu0 %vm501_vm4, %v1628_v12  ;;  %vm533_vm7 = vmand %vm273_vm15, %vm405_vm0 }
  0x90   :  { %1568 = vmatpush3.msk.msra.mxu1 %vm533_vm7, %v1628_v12  ;;  %vm516_vm9 = vmand %vm256_vm2, %vm388_vm3 }
  0x91   :  { %1534 = vmatprep.subr.msk.mxu0 %vm516_vm9, %v1628_v12  ;;  %vm548_vm12 = vmand %vm288_vm5, %vm420_vm6 }
  0x92   :  { %1569 = vmatprep.subr.msk.mxu1 %vm548_vm12, %v1628_v12  ;;  %vm500_vm13 = vmand %vm240_vm8, %vm372_vm11 }
  0x93   :  { %1535 = vmatpush3.msk.msra.mxu0 %vm500_vm13, %v1628_v12  ;;  %vm532_vm15 = vmand %vm272_vm10, %vm404_vm14 }
  0x94   :  { %1570 = vmatpush3.msk.msra.mxu1 %vm532_vm15, %v1628_v12  ;;  %1070 = vmatmul.mubr.f32.vlgmr.msra.gmra.mxu0 %v2145_v52 }
  0x95   :  { %1140 = vmatmul.mubr.f32.vlgmr.msra.gmra.mxu1 %v2178_v60 }
 0x114   :  { %v1466_v28 = vpop.f32.mrf.mxu0 }
 0x115   :  { %v1501_v29 = vpop.f32.mrf.mxu1 }
 0x116   :  { %v1467_v30 = vpop.f32.mrf.mxu0 }
 0x117   :  { %v1502_v31 = vpop.f32.mrf.mxu1  ;;  %v1468_v32 = vadd.f32 %v1467_v30, %v1466_v28 }
 0x118   :  { %v1503_v33 = vadd.f32 %v1502_v31, %v1501_v29 }
 0x11a   :  { %v1002_v37 = vadd.f32 %v1503_v33, %v1468_v32 }
 0x154   :  { %v1536_v34 = vpop.f32.mrf.mxu0 }
 0x155   :  { %v1571_v35 = vpop.f32.mrf.mxu1 }
 0x156   :  { %v1537_v36 = vpop.f32.mrf.mxu0 }
 0x157   :  { %v1538_v38 = vadd.f32 %v1537_v36, %v1536_v34  ;;  %v1572_v39 = vpop.f32.mrf.mxu1 }
 0x158   :  { %v1573_v12 = vadd.f32 %v1572_v39, %v1571_v35 }
 0x159   :  { %v1072_v40 = vadd.f32 %v1538_v38, %v1002_v37 }
 0x15b   :  { %v1142_v42 = vadd.f32 %v1573_v12, %v1072_v40 }
 0x15d   :  { %v1145_v43 = vadd.f32 %v1142_v42, %v820_v41 }
 0x15f   :  { %1146 = vst [vmem:[#allocation2] sm:$0x3] %v1145_v43 }
 0x166   :  { %v1150_v45 = vld [vmem:[#allocation2] sm:$0x3] }
 0x167   :  { %v1158_v46 = vmul.f32 %v1433_v44, %v1150_v45 }
 0x169   :  { %1159 = vst [vmem:[#allocation6] sm:$0x3] %v1158_v46 }
 0x16a   :  { %1614 = shalt.err (!%p1611_p9)
}
 0x16b   :  { %1169 = dma.vmem_to_hbm [thread:$0]  %s1167_s28, 32, %s2354_s4, [#allocation5]  }
 0x16c   :  { %1625 = dma.done.wait [#allocation5], 32  }
 0x16d   :  { %1626 = vsyncadd [#allocation5], 4294967264 }
 0x16e   :  { %1173 = vsyncpa [#allocation4], 1 }
 0x16f   :  { %1174 = vsyncpa [#allocation5], 1 }

</bundles_post_ra>
